<compile_context>
chip_gen: v6e
topology: v6e:2x2x1
jax: 0.10.0
libtpu: 0.0.40
codegen_flags: <defaults>
</compile_context>

<pallas_src>
import jax
import jax.numpy as jnp
from jax.experimental import pallas as pl
from jax.experimental.pallas import tpu as pltpu

IN_FEATURES = 30 * 30   # 900
H1, H2, OUT = 128, 64, 10


def mlp2_kernel(x_ref, w1_ref, b1_ref, w2_ref, b2_ref, w3_ref, b3_ref, out_ref):
    # X tile arrives already in bf16 (binding HBM stream halved vs f32).
    x = x_ref[...]                                             # [TB, 900] bf16

    # Hidden layer 1: Linear(900 -> 128) + ReLU   (bf16 matmul, f32 accum)
    h1 = jnp.dot(x, w1_ref[...], preferred_element_type=jnp.float32)
    h1 = jnp.maximum(h1 + b1_ref[...].astype(jnp.float32), 0.0)

    # Hidden layer 2: Linear(128 -> 64) + ReLU
    h2 = jnp.dot(h1.astype(jnp.bfloat16), w2_ref[...],
                 preferred_element_type=jnp.float32)
    h2 = jnp.maximum(h2 + b2_ref[...].astype(jnp.float32), 0.0)

    # Output layer: Linear(64 -> 10)
    logits = jnp.dot(h2.astype(jnp.bfloat16), w3_ref[...],
                     preferred_element_type=jnp.float32)
    logits = logits + b3_ref[...].astype(jnp.float32)

    # LogSoftmax over dim=1 — numerically stable, f32, and strictly row-local
    # (this keeps garbage rows of a partial edge tile from touching valid rows).
    m = jnp.max(logits, axis=-1, keepdims=True)
    shifted = logits - m
    lse = jnp.log(jnp.sum(jnp.exp(shifted), axis=-1, keepdims=True))
    out_ref[...] = shifted - lse                               # [TB, 10] log-probs


def _round_up(n, m):
    return ((n + m - 1) // m) * m


def mlp2_forward(x_nchw, params, *, max_tile=2048):
    """x_nchw: [B, 1, 30, 30] (any float dtype) -> log-probs [B, 10] float32."""
    w1, b1, w2, b2, w3, b3 = params
    B = x_nchw.shape[0]
    x_flat = x_nchw.reshape(B, -1)                             # Flatten() -> [B, 900]
    assert x_flat.shape[1] == IN_FEATURES

    # Stream X in bf16.  Under jit the convert fuses into the pallas_call
    # operand (allow_input_fusion below), so this is not an extra HBM pass.
    if x_flat.dtype != jnp.bfloat16:
        x_flat = x_flat.astype(jnp.bfloat16)

    # Batch tile: multiple of 8 (sublane), capped at max_tile, and sized so
    # any batch large enough produces >= 2 grid steps (v7x megacore sharding
    # via dimension_semantics=("parallel",) needs >= 2 tiles to engage).
    TB = min(max_tile, max(8, _round_up(pl.cdiv(B, 2), 8)))
    num_tiles = pl.cdiv(B, TB)   # no host-side padding; edge block is partial

    # Weights/biases: constant index_map -> VMEM-resident across grid steps.
    pinned = lambda shape: pl.BlockSpec(shape, lambda i: (0, 0))

    # Advisory cost estimate.
    flops = 2 * B * (IN_FEATURES * H1 + H1 * H2 + H2 * OUT)
    weight_bytes = sum(int(a.size) * a.dtype.itemsize for a in (w1, b1, w2, b2, w3, b3))
    bytes_accessed = B * IN_FEATURES * 2 + weight_bytes + B * OUT * 4
    cost = pl.CostEstimate(flops=flops, transcendentals=B * (OUT + 1),
                           bytes_accessed=bytes_accessed)

    out = pl.pallas_call(
        mlp2_kernel,
        out_shape=jax.ShapeDtypeStruct((B, OUT), jnp.float32),
        grid=(num_tiles,),
        in_specs=[
            pl.BlockSpec((TB, IN_FEATURES), lambda i: (i, 0)),   # X: tiled over batch
            pinned(w1.shape), pinned(b1.shape),
            pinned(w2.shape), pinned(b2.shape),
            pinned(w3.shape), pinned(b3.shape),
        ],
        out_specs=pl.BlockSpec((TB, OUT), lambda i: (i, 0)),
        compiler_params=pltpu.CompilerParams(
            dimension_semantics=("parallel",),        # both TCs on v7x
            vmem_limit_bytes=48 << 20,                # ~15 MiB actually used at TB=2048
            # Allow XLA to fuse the f32->bf16 convert / reshape producing X
            # into the call's operand (input 0 only).
            allow_input_fusion=[True, False, False, False, False, False, False],
        ),
        cost_estimate=cost,
    )(x_flat, w1, b1, w2, b2, w3, b3)

    return out


def init_params(key):
    """Deterministic init mimicking torch.nn.Linear default:
    U(-1/sqrt(fan_in), 1/sqrt(fan_in)) for both weight and bias.
    Weights stored transposed ([in, out]) and in bf16 (f32 accumulation in-kernel)."""
    def linear(key, fan_in, fan_out):
        kw, kb = jax.random.split(key)
        bound = 1.0 / jnp.sqrt(fan_in)
        w = jax.random.uniform(kw, (fan_in, fan_out), jnp.float32, -bound, bound)
        b = jax.random.uniform(kb, (1, fan_out), jnp.float32, -bound, bound)
        return w.astype(jnp.bfloat16), b.astype(jnp.bfloat16)

    k1, k2, k3 = jax.random.split(key, 3)
    w1, b1 = linear(k1, IN_FEATURES, H1)
    w2, b2 = linear(k2, H1, H2)
    w3, b3 = linear(k3, H2, OUT)
    return (w1, b1, w2, b2, w3, b3)


if __name__ == "__main__":
    key = jax.random.PRNGKey(0)
    k_params, k_x = jax.random.split(key)

    params = init_params(k_params)
    # Small NCHW input consistent with Flatten -> Linear(30*30, ...): [B,1,30,30]
    x = jax.random.normal(k_x, (2, 1, 30, 30), dtype=jnp.float32)

    fwd = jax.jit(mlp2_forward)          # jit so the bf16 convert fuses into the call
    log_probs = fwd(x, params)
    jax.block_until_ready(log_probs)

    # Sanity checks: correct shape, rows sum to 1 in prob space.
    assert log_probs.shape == (2, 10)
    row_sums = jnp.sum(jnp.exp(log_probs), axis=1)
    assert bool(jnp.all(jnp.abs(row_sums - 1.0) < 1e-3))

    # Cross-check against a plain-JAX reference of the same (bf16-matmul) math.
    w1, b1, w2, b2, w3, b3 = params
    xf = x.reshape(2, -1).astype(jnp.bfloat16)
    h1 = jnp.maximum(
        jnp.dot(xf, w1, preferred_element_type=jnp.float32) + b1.astype(jnp.float32), 0.0)
    h2 = jnp.maximum(
        jnp.dot(h1.astype(jnp.bfloat16), w2, preferred_element_type=jnp.float32)
        + b2.astype(jnp.float32), 0.0)
    lg = (jnp.dot(h2.astype(jnp.bfloat16), w3, preferred_element_type=jnp.float32)
          + b3.astype(jnp.float32))
    ref = jax.nn.log_softmax(lg, axis=1)
    assert bool(jnp.all(jnp.abs(ref - log_probs) < 2e-2))

    print("KERNEL_OK")
</pallas_src>

<mosaic_0001>
module attributes {stable_mosaic.version = 11 : i64} {
  func.func @mlp2_kernel(%arg0: i32, %arg1: memref<8x900xbf16, #tpu.memory_space<vmem>>, %arg2: memref<900x128xbf16, #tpu.memory_space<vmem>>, %arg3: memref<1x128xbf16, #tpu.memory_space<vmem>>, %arg4: memref<128x64xbf16, #tpu.memory_space<vmem>>, %arg5: memref<1x64xbf16, #tpu.memory_space<vmem>>, %arg6: memref<64x10xbf16, #tpu.memory_space<vmem>>, %arg7: memref<1x10xbf16, #tpu.memory_space<vmem>>, %arg8: memref<8x10xf32, #tpu.memory_space<vmem>>) attributes {dimension_semantics = [#tpu.dimension_semantics<parallel>], iteration_bounds = array<i64: 1>, scalar_prefetch = 0 : i64, scratch_operands = 0 : i64, tpu.core_type = #tpu.core_type<tc>, window_params = [{transform_indices = @transform_0, window_bounds = array<i64: 8, 900>}, {pipeline_mode = #tpu.pipeline_mode<synchronous>, transform_indices = @transform_1, window_bounds = array<i64: 900, 128>}, {pipeline_mode = #tpu.pipeline_mode<synchronous>, transform_indices = @transform_2, window_bounds = array<i64: 1, 128>}, {pipeline_mode = #tpu.pipeline_mode<synchronous>, transform_indices = @transform_3, window_bounds = array<i64: 128, 64>}, {pipeline_mode = #tpu.pipeline_mode<synchronous>, transform_indices = @transform_4, window_bounds = array<i64: 1, 64>}, {pipeline_mode = #tpu.pipeline_mode<synchronous>, transform_indices = @transform_5, window_bounds = array<i64: 64, 10>}, {pipeline_mode = #tpu.pipeline_mode<synchronous>, transform_indices = @transform_6, window_bounds = array<i64: 1, 10>}, {transform_indices = @transform_7, window_bounds = array<i64: 8, 10>}]} {
    %c0 = arith.constant 0 : index
    %c0_0 = arith.constant 0 : index
    %0 = vector.load %arg1[%c0, %c0_0] : memref<8x900xbf16, #tpu.memory_space<vmem>>, vector<8x900xbf16>
    %c0_1 = arith.constant 0 : index
    %c0_2 = arith.constant 0 : index
    %1 = vector.load %arg2[%c0_1, %c0_2] : memref<900x128xbf16, #tpu.memory_space<vmem>>, vector<900x128xbf16>
    %cst = arith.constant dense<0.000000e+00> : vector<8x128xf32>
    %2 = tpu.matmul %0, %1, %cst {dimension_numbers = #tpu.dot_dimension_numbers<[1], [0], [0], [1], [0, 0, 1, 1], [], []>} : vector<8x900xbf16>, vector<900x128xbf16>, vector<8x128xf32> -> vector<8x128xf32>
    %c0_3 = arith.constant 0 : index
    %c0_4 = arith.constant 0 : index
    %3 = vector.load %arg3[%c0_3, %c0_4] : memref<1x128xbf16, #tpu.memory_space<vmem>>, vector<1x128xbf16>
    %4 = arith.extf %3 : vector<1x128xbf16> to vector<1x128xf32>
    %5 = vector.broadcast %4 : vector<1x128xf32> to vector<8x128xf32>
    %6 = arith.addf %2, %5 : vector<8x128xf32>
    %cst_5 = arith.constant 0.000000e+00 : f32
    %7 = vector.broadcast %cst_5 : f32 to vector<8x128xf32>
    %8 = arith.maximumf %6, %7 : vector<8x128xf32>
    %9 = arith.truncf %8 : vector<8x128xf32> to vector<8x128xbf16>
    %c0_6 = arith.constant 0 : index
    %c0_7 = arith.constant 0 : index
    %10 = vector.load %arg4[%c0_6, %c0_7] : memref<128x64xbf16, #tpu.memory_space<vmem>>, vector<128x64xbf16>
    %cst_8 = arith.constant dense<0.000000e+00> : vector<8x64xf32>
    %11 = tpu.matmul %9, %10, %cst_8 {dimension_numbers = #tpu.dot_dimension_numbers<[1], [0], [0], [1], [0, 0, 1, 1], [], []>} : vector<8x128xbf16>, vector<128x64xbf16>, vector<8x64xf32> -> vector<8x64xf32>
    %c0_9 = arith.constant 0 : index
    %c0_10 = arith.constant 0 : index
    %12 = vector.load %arg5[%c0_9, %c0_10] : memref<1x64xbf16, #tpu.memory_space<vmem>>, vector<1x64xbf16>
    %13 = arith.extf %12 : vector<1x64xbf16> to vector<1x64xf32>
    %14 = vector.broadcast %13 : vector<1x64xf32> to vector<8x64xf32>
    %15 = arith.addf %11, %14 : vector<8x64xf32>
    %cst_11 = arith.constant 0.000000e+00 : f32
    %16 = vector.broadcast %cst_11 : f32 to vector<8x64xf32>
    %17 = arith.maximumf %15, %16 : vector<8x64xf32>
    %18 = arith.truncf %17 : vector<8x64xf32> to vector<8x64xbf16>
    %c0_12 = arith.constant 0 : index
    %c0_13 = arith.constant 0 : index
    %19 = vector.load %arg6[%c0_12, %c0_13] : memref<64x10xbf16, #tpu.memory_space<vmem>>, vector<64x10xbf16>
    %cst_14 = arith.constant dense<0.000000e+00> : vector<8x10xf32>
    %20 = tpu.matmul %18, %19, %cst_14 {dimension_numbers = #tpu.dot_dimension_numbers<[1], [0], [0], [1], [0, 0, 1, 1], [], []>} : vector<8x64xbf16>, vector<64x10xbf16>, vector<8x10xf32> -> vector<8x10xf32>
    %c0_15 = arith.constant 0 : index
    %c0_16 = arith.constant 0 : index
    %21 = vector.load %arg7[%c0_15, %c0_16] : memref<1x10xbf16, #tpu.memory_space<vmem>>, vector<1x10xbf16>
    %22 = arith.extf %21 : vector<1x10xbf16> to vector<1x10xf32>
    %23 = vector.broadcast %22 : vector<1x10xf32> to vector<8x10xf32>
    %24 = arith.addf %20, %23 : vector<8x10xf32>
    %cst_17 = arith.constant dense<0xFF800000> : vector<8xf32>
    %25 = vector.multi_reduction <maximumf>, %24, %cst_17 [1] : vector<8x10xf32> to vector<8xf32>
    %26 = vector.shape_cast %25 : vector<8xf32> to vector<8x1xf32>
    %27 = vector.broadcast %26 : vector<8x1xf32> to vector<8x10xf32>
    %28 = arith.subf %24, %27 : vector<8x10xf32>
    %29 = math.exp %28 : vector<8x10xf32>
    %cst_18 = arith.constant dense<0.000000e+00> : vector<8xf32>
    %30 = vector.multi_reduction <add>, %29, %cst_18 [1] : vector<8x10xf32> to vector<8xf32>
    %31 = vector.shape_cast %30 : vector<8xf32> to vector<8x1xf32>
    %32 = math.log %31 : vector<8x1xf32>
    %33 = vector.broadcast %32 : vector<8x1xf32> to vector<8x10xf32>
    %34 = arith.subf %28, %33 : vector<8x10xf32>
    %c0_19 = arith.constant 0 : index
    %c0_20 = arith.constant 0 : index
    %35 = vector.load %arg8[%c0_19, %c0_20] : memref<8x10xf32, #tpu.memory_space<vmem>>, vector<8x10xf32>
    tpu.vector_store %arg8[%c0_19, %c0_20], %34 {strides = array<i32>} : memref<8x10xf32, #tpu.memory_space<vmem>>, vector<8x10xf32>,
    return
  }
  func.func @transform_0(%arg0: i32) -> (i32, i32) {
    %c0_i32 = arith.constant 0 : i32
    %c0_i32_0 = arith.constant 0 : i32
    return %arg0, %c0_i32 : i32, i32
  }
  func.func @transform_1(%arg0: i32) -> (i32, i32) {
    %c0_i32 = arith.constant 0 : i32
    %c0_i32_0 = arith.constant 0 : i32
    %c0_i32_1 = arith.constant 0 : i32
    return %c0_i32, %c0_i32_0 : i32, i32
  }
  func.func @transform_2(%arg0: i32) -> (i32, i32) {
    %c0_i32 = arith.constant 0 : i32
    %c0_i32_0 = arith.constant 0 : i32
    %c0_i32_1 = arith.constant 0 : i32
    return %c0_i32, %c0_i32_0 : i32, i32
  }
  func.func @transform_3(%arg0: i32) -> (i32, i32) {
    %c0_i32 = arith.constant 0 : i32
    %c0_i32_0 = arith.constant 0 : i32
    %c0_i32_1 = arith.constant 0 : i32
    return %c0_i32, %c0_i32_0 : i32, i32
  }
  func.func @transform_4(%arg0: i32) -> (i32, i32) {
    %c0_i32 = arith.constant 0 : i32
    %c0_i32_0 = arith.constant 0 : i32
    %c0_i32_1 = arith.constant 0 : i32
    return %c0_i32, %c0_i32_0 : i32, i32
  }
  func.func @transform_5(%arg0: i32) -> (i32, i32) {
    %c0_i32 = arith.constant 0 : i32
    %c0_i32_0 = arith.constant 0 : i32
    %c0_i32_1 = arith.constant 0 : i32
    return %c0_i32, %c0_i32_0 : i32, i32
  }
  func.func @transform_6(%arg0: i32) -> (i32, i32) {
    %c0_i32 = arith.constant 0 : i32
    %c0_i32_0 = arith.constant 0 : i32
    %c0_i32_1 = arith.constant 0 : i32
    return %c0_i32, %c0_i32_0 : i32, i32
  }
  func.func @transform_7(%arg0: i32) -> (i32, i32) {
    %c0_i32 = arith.constant 0 : i32
    %c0_i32_0 = arith.constant 0 : i32
    return %arg0, %c0_i32 : i32, i32
  }
}

</mosaic_0001>

<bundles_post_ra>
// kernel: mlp2_forward.1
= control target key start
LH: loop header
LB: loop body
LE: loop exit
PB: predicated region body
PF: predicated region fallthrough
CT: control target
= control target key end

     0   :  { %12 = vsyncpa [#allocation3], 0  ;;  %s1455_s0 = inlined_call_operand.vmem [shape: bf16[2,900], index: 0, kind: input, shape index: {}]   ;;  %s1456_s1 = inlined_call_operand.hbm [shape: bf16[900,128], index: 1, kind: input, shape index: {}]   ;;  %s1457_s2 = inlined_call_operand.vmem [shape: bf16[1,128], index: 2, kind: input, shape index: {}]   ;;  %s1458_s3 = inlined_call_operand.vmem [shape: bf16[128,64], index: 3, kind: input, shape index: {}]   ;;  %s1459_s4 = inlined_call_operand.vmem [shape: bf16[1,64], index: 4, kind: input, shape index: {}]   ;;  %s1460_s5 = inlined_call_operand.vmem [shape: bf16[64,10], index: 5, kind: input, shape index: {}]   ;;  %s1461_s6 = inlined_call_operand.vmem [shape: bf16[1,10], index: 6, kind: input, shape index: {}]   ;;  %s1462_s7 = inlined_call_operand.hbm [shape: f32[2,10], index: 7, kind: output, shape index: {}]  }
   0x1   :  { %13 = vsyncpa [#allocation4], 0  ;;  %s1294_s24 = smov [#allocation2]  }
   0x2   :  { %s21_s25 = sshll.u32 %s1294_s24, 4  ;;  %s22_s25 = int_to_ptr.vmem [resolvable:$true] %s21_s25 }
   0x3   :  { %s1258_s26 = scalar_lea.vmem %s22_s25, 7232  ;;  %p1263_p1 = scmp.lt.s32.totalorder %s22_s25, %s22_s25 }
   0x4   :  { %p1259_p0 = scmp.ne.s32.totalorder %s22_s25, %s1258_s26  ;;  %p1264_p2 = scmp.lt.s32.totalorder %s1258_s26, %s1258_s26 }
   0x6   :  { %p1265_p3 = por %p1264_p2, %p1263_p1 }
   0x8   :  { %p1266_p4 = pnand %p1265_p3, %p1259_p0 }
   0xa   :  { %1269 = shalt.err (!%p1266_p4)
}
   0xb   :  { %s1295_s27 = smov 64   ;;  %s1296_s28 = smov 4  }
   0xc   :  { %27 = dma.hbm_to_vmem [thread:$0]  %s1456_s1, 7232, %s22_s25, [#allocation3], %s1295_s27, %s1295_s27, %s1296_s28  }
   0xd   :  { %1290 = dma.done.wait [#allocation3], 7232  }
   0xe   :  { %1291 = vsyncadd [#allocation3], 4294960064  ;;  %v1171_v0 = vld [vmem:[#allocation2 + $0x78] sm:$0xff]   ;;  %v1175_v4 = vld [vmem:[#allocation2 + $0x70] sm:$0xff]   ;;  %v161_v24 = vlaneseq  ;;  %v1297_v25 = vmov 1966171168  }
   0xf   :  { %v1172_v1 = vld [vmem:[#allocation2 + $0xf8] sm:$0xff]   ;;  %1049 = vmatprep.subr.bf16.mxu0 %v1171_v0  ;;  %v1176_v5 = vld [vmem:[#allocation2 + $0xf0] sm:$0xff]   ;;  %v1179_v8 = vld [vmem:[#allocation2 + $0x68] sm:$0xff]   ;;  %v174_v26 = vunpack.c.l.s4 %v1297_v25  ;;  %v1298_v42 = vmov 0   ;;  %vm583_vm0 = vcmask 31744   ;;  %vm587_vm1 = vcmask 1041408  }
  0x10   :  { %v1173_v2 = vld [vmem:[#allocation2 + $0x38] sm:$0xff]   ;;  %1071 = vmatprep.subr.bf16.mxu1 %v1172_v1  ;;  %v1177_v6 = vld [vmem:[#allocation2 + $0x30] sm:$0xff]   ;;  %v1180_v9 = vld [vmem:[#allocation2 + $0xe8] sm:$0xff]   ;;  %v1347_v31 = vshrl.u32 %v161_v24, 7  ;;  %vm1300_vm2 = vmmov 0   ;;  %vm903_vm3 = vcmask 523264  }
  0x11   :  { %v1174_v3 = vld [vmem:[#allocation2 + $0xb8] sm:$0xff]   ;;  %1050 = vmatpush3.bf16.msra.mxu0 %v1173_v2  ;;  %v1178_v7 = vld [vmem:[#allocation2 + $0xb0] sm:$0xff]   ;;  %v1181_v10 = vld [vmem:[#allocation2 + $0x28] sm:$0xff]   ;;  %v175_v32 = vunpack.c.0.s8 %v174_v26  ;;  %vm947_vm4 = vcmask 80896  }
  0x12   :  { %1072 = vmatpush3.bf16.msra.mxu1 %v1174_v3  ;;  %1051 = vmatprep.subr.bf16.mxu0 %v1175_v4  ;;  %v1182_v11 = vld [vmem:[#allocation2 + $0xa8] sm:$0xff]   ;;  %v1183_v12 = vld [vmem:[#allocation2 + $0x60] sm:$0xff]   ;;  %v1187_v16 = vld [vmem:[#allocation2 + $0x58] sm:$0xff]  }
  0x13   :  { %1073 = vmatprep.subr.bf16.mxu1 %v1176_v5  ;;  %v1184_v13 = vld [vmem:[#allocation2 + $0xe0] sm:$0xff]   ;;  %v1188_v17 = vld [vmem:[#allocation2 + $0xd8] sm:$0xff]   ;;  %v1191_v20 = vld [vmem:[#allocation2 + $0x50] sm:$0xff]   ;;  %v1350_v37 = vsub.s32 %v175_v32, %v1347_v31 }
  0x14   :  { %v1185_v14 = vld [vmem:[#allocation2 + $0x20] sm:$0xff]   ;;  %v1189_v18 = vld [vmem:[#allocation2 + $0x18] sm:$0xff]   ;;  %v1192_v21 = vld [vmem:[#allocation2 + $0xd0] sm:$0xff]  }
  0x15   :  { %1052 = vmatpush3.bf16.msra.mxu0 %v1177_v6  ;;  %v1186_v15 = vld [vmem:[#allocation2 + $0xa0] sm:$0xff]   ;;  %v1190_v19 = vld [vmem:[#allocation2 + $0x98] sm:$0xff]   ;;  %v1193_v22 = vld [vmem:[#allocation2 + $0x10] sm:$0xff]  }
  0x16   :  { %1074 = vmatpush3.bf16.msra.mxu1 %v1178_v7  ;;  %1053 = vmatprep.subr.bf16.mxu0 %v1179_v8  ;;  %v1194_v23 = vld [vmem:[#allocation2 + $0x90] sm:$0xff]   ;;  %v1195_v27 = vld [vmem:[#allocation2 + $0x48] sm:$0xff]   ;;  %v1199_v33 = vld [vmem:[#allocation2 + $0x40] sm:$0xff]  }
  0x17   :  { %1075 = vmatprep.subr.bf16.mxu1 %v1180_v9  ;;  %v1196_v28 = vld [vmem:[#allocation2 + $0xc8] sm:$0xff]   ;;  %v1200_v34 = vld [vmem:[#allocation2 + $0xc0] sm:$0xff]   ;;  %v1206_v40 = vld [vmem:[%s1455_s0 + $0x10] ss:$8 sps:$4 sm:$0xff]  }
  0x18   :  { %v1197_v29 = vld [vmem:[#allocation2 + $0x8] sm:$0xff]   ;;  %v1201_v35 = vld [vmem:[#allocation2] sm:$0xff]   ;;  %v1208_v41 = vld [vmem:[%s1455_s0 + $0x14] ss:$8 sps:$4 sm:$0xff]   ;;  %v193_v46 = vrot.slane %v1206_v40, %v1350_v37 }
  0x19   :  { %1054 = vmatpush3.bf16.msra.mxu0 %v1181_v10  ;;  %v1198_v30 = vld [vmem:[#allocation2 + $0x88] sm:$0xff]   ;;  %v1202_v36 = vld [vmem:[#allocation2 + $0x80] sm:$0xff]   ;;  %v1209_v44 = vld [vmem:[#allocation2 + $0x178] sm:$0xff]   ;;  %v1371_v47 = vrot.slane %v1208_v41, %v1350_v37 }
  0x1a   :  { %1076 = vmatpush3.bf16.msra.mxu1 %v1182_v11  ;;  %1055 = vmatprep.subr.bf16.mxu0 %v1183_v12  ;;  %v1203_v38 = vld [vmem:[%s1455_s0] ss:$8 sps:$4 sm:$0xff]   ;;  %v1205_v39 = vld [vmem:[%s1455_s0 + $0x4] ss:$8 sps:$4 sm:$0xff]   ;;  %v1210_v53 = vld [vmem:[#allocation2 + $0x138] sm:$0xff]  }
  0x1b   :  { %1077 = vmatprep.subr.bf16.mxu1 %v1184_v13  ;;  %v179_v43 = vrot.slane %v1203_v38, %v1350_v37  ;;  %v1367_v45 = vrot.slane %v1205_v39, %v1350_v37  ;;  %v1212_v54 = vld [vmem:[#allocation2 + $0x170] sm:$0xff]   ;;  %v1211_v58 = vld [vmem:[#allocation2 + $0x1b8] sm:$0xff]   ;;  %v1215_v61 = vld [vmem:[#allocation2 + $0x168] sm:$0xff]  }
  0x1c   :  { %v1213_v60 = vld [vmem:[#allocation2 + $0x130] sm:$0xff]   ;;  %v1216_v63 = vld [vmem:[#allocation2 + $0x128] sm:$0xff]   ;;  %v1218_v0 = vld [vmem:[#allocation2 + $0x160] sm:$0xff]  }
  0x1d   :  { %1056 = vmatpush3.bf16.msra.mxu0 %v1185_v14  ;;  %v202_v48 = vcombine.high %v179_v43, %v193_v46  ;;  %v201_v49 = vcombine.low %v179_v43, %v193_v46  ;;  %v204_v50 = vcombine.high %v1367_v45, %v1371_v47  ;;  %v1214_v62 = vld [vmem:[#allocation2 + $0x1b0] sm:$0xff]   ;;  %v1217_v1 = vld [vmem:[#allocation2 + $0x1a8] sm:$0xff]   ;;  %v1219_v2 = vld [vmem:[#allocation2 + $0x120] sm:$0xff]   ;;  %v203_v14 = vcombine.low %v1367_v45, %v1371_v47 }
  0x1e   :  { %1078 = vmatpush3.bf16.msra.mxu1 %v1186_v15  ;;  %1057 = vmatprep.subr.bf16.mxu0 %v1187_v16  ;;  %v1221_v3 = vld [vmem:[#allocation2 + $0x158] sm:$0xff]   ;;  %v1220_v4 = vld [vmem:[#allocation2 + $0x1a0] sm:$0xff]   ;;  %v1224_v6 = vld [vmem:[#allocation2 + $0x150] sm:$0xff]   ;;  %v163_v43 = vsub.s32 0, %v1347_v31 }
  0x1f   :  { %1079 = vmatprep.subr.bf16.mxu1 %v1188_v17  ;;  %v225_v51 = vrot.slane %v202_v48, %v1350_v37  ;;  %v211_v52 = vrot.slane %v201_v49, %v1350_v37  ;;  %v232_v55 = vrot.slane %v204_v50, %v1350_v37  ;;  %v1222_v5 = vld [vmem:[#allocation2 + $0x118] sm:$0xff]   ;;  %v1225_v8 = vld [vmem:[#allocation2 + $0x110] sm:$0xff]   ;;  %v1227_v10 = vld [vmem:[#allocation2 + $0x148] sm:$0xff]   ;;  %v218_v17 = vrot.slane %v203_v14, %v1350_v37 }
  0x20   :  { %v1223_v7 = vld [vmem:[#allocation2 + $0x198] sm:$0xff]   ;;  %v1226_v9 = vld [vmem:[#allocation2 + $0x190] sm:$0xff]   ;;  %v1228_v11 = vld [vmem:[#allocation2 + $0x108] sm:$0xff]  }
  0x21   :  { %1058 = vmatpush3.bf16.msra.mxu0 %v1189_v18  ;;  %623 = vmatprep.mubr.bf16.mxu0 %v225_v51  ;;  %v235_v56 = vcombine.high %v225_v51, %v225_v51  ;;  %v233_v57 = vcombine.high %v211_v52, %v211_v52  ;;  %v236_v59 = vcombine.high %v232_v55, %v232_v55  ;;  %v1230_v12 = vld [vmem:[#allocation2 + $0x140] sm:$0xff]   ;;  %v1229_v13 = vld [vmem:[#allocation2 + $0x188] sm:$0xff]   ;;  %v1238_v26 = vld [vmem:[%s1458_s3 + $0x18] sm:$0xff]  }
  0x22   :  { %1080 = vmatpush3.bf16.msra.mxu1 %v1190_v19  ;;  %1059 = vmatprep.subr.bf16.mxu0 %v1191_v20  ;;  %v1231_v15 = vld [vmem:[#allocation2 + $0x100] sm:$0xff]   ;;  %v234_v20 = vcombine.high %v218_v17, %v218_v17  ;;  %v1236_v24 = vld [vmem:[%s1458_s3 + $0x28] sm:$0xff]   ;;  %v1243_v32 = vld [vmem:[%s1460_s5 + $0x10] sm:$0xff]  }
  0x23   :  { %1081 = vmatprep.subr.bf16.mxu1 %v1192_v21  ;;  %663 = vmatprep.mubr.bf16.mxu1 %v235_v56  ;;  %v1232_v16 = vld [vmem:[#allocation2 + $0x180] sm:$0xff]   ;;  %v1234_v21 = vld [vmem:[%s1458_s3 + $0x38] sm:$0xff]   ;;  %v1244_v31 = vld [vmem:[%s1460_s5 + $0x8] sm:$0xff]  }
  0x24   :  { %v1233_v18 = vld [vmem:[#allocation2 + $0x1c0] ss:$0 sps:$4 sm:$0x33]  }
  0x25   :  { %1060 = vmatpush3.bf16.msra.mxu0 %v1193_v22  ;;  %v589_v19 = vsel %vm587_vm1, %v1233_v18, 0  ;;  %v1299_v22 = vmov 0.0   ;;  %v1237_v25 = vld [vmem:[%s1458_s3 + $0x20] sm:$0xff]  }
  0x26   :  { %1082 = vmatpush3.bf16.msra.mxu1 %v1194_v23  ;;  %1061 = vmatprep.subr.bf16.mxu0 %v1195_v27  ;;  %v1235_v23 = vld [vmem:[%s1458_s3 + $0x30] sm:$0xff]   ;;  %v159_v41 = vld [vmem:[%s1457_s2] sm:$0x1] }
  0x27   :  { %1083 = vmatprep.subr.bf16.mxu1 %v1196_v28  ;;  %v1239_v27 = vld [vmem:[%s1458_s3 + $0x10] sm:$0xff]   ;;  %v1240_v28 = vld [vmem:[%s1458_s3 + $0x8] sm:$0xff]  }
  0x29   :  { %1062 = vmatpush3.bf16.msra.mxu0 %v1197_v29  ;;  %v1241_v29 = vld [vmem:[%s1458_s3] sm:$0xff]  }
  0x2a   :  { %1084 = vmatpush3.bf16.msra.mxu1 %v1198_v30  ;;  %1063 = vmatprep.subr.bf16.mxu0 %v1199_v33  ;;  %v1242_v30 = vld [vmem:[%s1460_s5 + $0x18] sm:$0xff]  }
  0x2b   :  { %1085 = vmatprep.subr.bf16.mxu1 %v1200_v34 }
  0x2d   :  { %1064 = vmatpush3.bf16.msra.mxu0 %v1201_v35 }
  0x2e   :  { %1086 = vmatpush3.bf16.msra.mxu1 %v1202_v36  ;;  %1093 = vmatprep.subr.bf16.mxu0 %v1209_v44 }
  0x2f   :  { %711 = vmatprep.subr.bf16.mxu1 %v1298_v42 }
  0x30   :  { %624 = vmatmul.mubr.bf16.vlgmr.msra.gmra.mxu0 %v211_v52 }
  0x31   :  { %1094 = vmatpush3.bf16.msra.mxu0 %v1210_v53  ;;  %664 = vmatmul.mubr.bf16.vlgmr.msra.gmra.mxu1 %v233_v57 }
  0x32   :  { %1095 = vmatprep.subr.bf16.mxu0 %v1212_v54  ;;  %712 = vmatpush1.bf16.msra.mxu1 %v1211_v58 }
  0x33   :  { %703 = vmatprep.mubr.bf16.mxu0 %v232_v55  ;;  %713 = vmatprep.subr.bf16.mxu1 %v1298_v42 }
  0x34   :  { %1035 = vmatprep.mubr.msk.bf16.mxu1 %vm583_vm0, %v236_v59 }
  0x35   :  { %1096 = vmatpush3.bf16.msra.mxu0 %v1213_v60 }
  0x36   :  { %1097 = vmatprep.subr.bf16.mxu0 %v1215_v61  ;;  %714 = vmatpush1.bf16.msra.mxu1 %v1214_v62  ;;  %v1245_v62 = vld [vmem:[%s1460_s5] sm:$0xff]  }
  0x37   :  { %715 = vmatprep.subr.bf16.mxu1 %v1298_v42 }
  0x39   :  { %1098 = vmatpush3.bf16.msra.mxu0 %v1216_v63  ;;  %v769_v63 = vld [vmem:[%s1459_s4] sm:$0x1] }
  0x3a   :  { %1099 = vmatprep.subr.bf16.mxu0 %v1218_v0  ;;  %716 = vmatpush1.bf16.msra.mxu1 %v1217_v1  ;;  %v770_v0 = vunpack.c.l.bf16 %v769_v63 }
  0x3b   :  { %717 = vmatprep.subr.bf16.mxu1 %v1298_v42 }
  0x3c   :  { %v774_v1 = vrot.slane %v770_v0, %v163_v43 }
  0x3d   :  { %1100 = vmatpush3.bf16.msra.mxu0 %v1219_v2 }
  0x3e   :  { %1101 = vmatprep.subr.bf16.mxu0 %v1221_v3  ;;  %718 = vmatpush1.bf16.msra.mxu1 %v1220_v4 }
  0x3f   :  { %719 = vmatprep.subr.bf16.mxu1 %v1298_v42 }
  0x41   :  { %1102 = vmatpush3.bf16.msra.mxu0 %v1222_v5 }
  0x42   :  { %1103 = vmatprep.subr.bf16.mxu0 %v1224_v6  ;;  %720 = vmatpush1.bf16.msra.mxu1 %v1223_v7 }
  0x43   :  { %721 = vmatprep.subr.bf16.mxu1 %v1298_v42 }
  0x45   :  { %1104 = vmatpush3.bf16.msra.mxu0 %v1225_v8 }
  0x46   :  { %1105 = vmatprep.subr.bf16.mxu0 %v1227_v10  ;;  %722 = vmatpush1.bf16.msra.mxu1 %v1226_v9  ;;  %v873_v9 = vld [vmem:[%s1461_s6] sm:$0x1] }
  0x47   :  { %723 = vmatprep.subr.bf16.mxu1 %v1298_v42  ;;  %v874_v10 = vunpack.c.l.bf16 %v873_v9 }
  0x49   :  { %1106 = vmatpush3.bf16.msra.mxu0 %v1228_v11  ;;  %v878_v11 = vrot.slane %v874_v10, %v163_v43 }
  0x4a   :  { %1107 = vmatprep.subr.bf16.mxu0 %v1230_v12  ;;  %724 = vmatpush1.bf16.msra.mxu1 %v1229_v13 }
  0x4b   :  { %725 = vmatprep.subr.bf16.mxu1 %v1298_v42 }
  0x4d   :  { %1108 = vmatpush3.bf16.msra.mxu0 %v1231_v15 }
  0x4e   :  { %726 = vmatpush1.bf16.msra.mxu1 %v1232_v16  ;;  %1129 = vmatprep.subr.bf16.mxu0 %v1299_v22 }
  0x4f   :  { %741 = vmatprep.subr.bf16.mxu1 %v1298_v42  ;;  %v160_v42 = vunpack.c.l.bf16 %v159_v41 }
  0x50   :  { %704 = vmatmul.mubr.bf16.vlgmr.msra.gmra.mxu0 %v218_v17 }
  0x51   :  { %1130 = vmatpush3.bf16.msra.mxu0 %v1234_v21  ;;  %1145 = vmatprep.mubr.msk.bf16.mxu0 %vm1300_vm2, %v1299_v22  ;;  %v164_v44 = vrot.slane %v160_v42, %v163_v43 }
  0x52   :  { %742 = vmatpush2.bf16.msra.mxu1 %v589_v19  ;;  %1131 = vmatprep.subr.bf16.mxu0 %v1299_v22 }
  0x53   :  { %1149 = vmatprep.subr.bf16.mxu1 %v1299_v22 }
  0x55   :  { %744 = vmatmul.mubr.bf16.vlgmr.msra.gmra.mxu1 %v234_v20  ;;  %1132 = vmatpush3.bf16.msra.mxu0 %v1235_v23 }
  0x56   :  { %1133 = vmatprep.subr.bf16.mxu0 %v1299_v22  ;;  %1157 = vmatprep.mubr.msk.bf16.mxu1 %vm1300_vm2, %v1299_v22 }
  0x57   :  { %1150 = vmatpush3.bf16.msra.mxu1 %v1242_v30 }
  0x58   :  { %1151 = vmatprep.subr.bf16.mxu1 %v1299_v22 }
  0x59   :  { %1134 = vmatpush3.bf16.msra.mxu0 %v1236_v24 }
  0x5a   :  { %1135 = vmatprep.subr.bf16.mxu0 %v1299_v22 }
  0x5b   :  { %1152 = vmatpush3.bf16.msra.mxu1 %v1243_v32 }
  0x5c   :  { %1153 = vmatprep.subr.bf16.mxu1 %v1299_v22 }
  0x5d   :  { %1136 = vmatpush3.bf16.msra.mxu0 %v1237_v25 }
  0x5e   :  { %1137 = vmatprep.subr.bf16.mxu0 %v1299_v22 }
  0x5f   :  { %1154 = vmatpush3.bf16.msra.mxu1 %v1244_v31 }
  0x60   :  { %1155 = vmatprep.subr.bf16.mxu1 %v1299_v22 }
  0x61   :  { %1138 = vmatpush3.bf16.msra.mxu0 %v1238_v26 }
  0x62   :  { %1139 = vmatprep.subr.bf16.mxu0 %v1299_v22 }
  0x63   :  { %1156 = vmatpush3.bf16.msra.mxu1 %v1245_v62 }
  0x65   :  { %1140 = vmatpush3.bf16.msra.mxu0 %v1239_v27 }
  0x66   :  { %1141 = vmatprep.subr.bf16.mxu0 %v1299_v22 }
  0x69   :  { %1142 = vmatpush3.bf16.msra.mxu0 %v1240_v28 }
  0x6a   :  { %1143 = vmatprep.subr.bf16.mxu0 %v1299_v22 }
  0x6d   :  { %1144 = vmatpush3.bf16.msra.mxu0 %v1241_v29 }
  0xf0   :  { %v1065_v33 = vpop.f32.mrf.mxu0 }
  0xf1   :  { %v1087_v34 = vpop.f32.mrf.mxu1 }
  0xf2   :  { %v1066_v35 = vpop.f32.mrf.mxu0 }
  0xf3   :  { %v1088_v36 = vpop.f32.mrf.mxu1  ;;  %v1067_v45 = vadd.f32 %v1066_v35, %v1065_v33 }
  0xf4   :  { %v1068_v37 = vpop.f32.mrf.mxu0  ;;  %v1089_v47 = vadd.f32 %v1088_v36, %v1087_v34 }
  0xf5   :  { %v1090_v38 = vpop.f32.mrf.mxu1  ;;  %v626_v46 = vadd.f32 %v1067_v45, %v164_v44 }
  0xf6   :  { %v1069_v39 = vpop.f32.mrf.mxu0 }
  0xf7   :  { %v1091_v40 = vpop.f32.mrf.mxu1  ;;  %v666_v50 = vadd.f32 %v1089_v47, %v626_v46 }
 0x110   :  { %v1109_v48 = vpop.f32.mrf.mxu0 }
 0x112   :  { %v1110_v49 = vpop.f32.mrf.mxu0 }
 0x113   :  { %v1111_v51 = vadd.f32 %v1110_v49, %v1109_v48 }
 0x114   :  { %v1112_v52 = vpop.f32.mrf.mxu0 }
 0x115   :  { %v706_v53 = vadd.f32 %v1111_v51, %v666_v50  ;;  %v745_v54 = vpop.f32.mrf.mxu1 }
 0x116   :  { %v1113_v55 = vpop.f32.mrf.mxu0 }
 0x117   :  { %v746_v56 = vadd.f32 %v745_v54, %v706_v53  ;;  %v747_v57 = vpop.f32.mrf.mxu1 }
 0x119   :  { %v751_v58 = vmax.f32 %v746_v56, 0.0  ;;  %v748_v59 = vpop.f32.mrf.mxu1 }
 0x11b   :  { %v752_v60 = vpack.c.bf16 %v751_v58, %v751_v58  ;;  %v749_v61 = vpop.f32.mrf.mxu1 }
 0x11d   :  { %1146 = vmatmul.mubr.bf16.vlgmr.msra.gmra.mxu0 %v752_v60 }
 0x1dd   :  { %v857_v2 = vpop.f32.mrf.mxu0 }
 0x1de   :  { %v858_v3 = vadd.f32 %v857_v2, %v774_v1 }
 0x1df   :  { %v1147_v4 = vpop.f32.mrf.mxu0 }
 0x1e0   :  { %v863_v5 = vmax.f32 %v858_v3, 0.0 }
 0x1e1   :  { %v860_v6 = vpop.f32.mrf.mxu0 }
 0x1e2   :  { %v864_v7 = vpack.c.bf16 %v863_v5, %v863_v5 }
 0x1e3   :  { %v1148_v8 = vpop.f32.mrf.mxu0 }
 0x1e4   :  { %1158 = vmatmul.mubr.msk.bf16.vlgmr.msra.gmra.mxu1 %vm903_vm3, %v864_v7 }
 0x2a4   :  { %v941_v12 = vpop.f32.mrf.mxu1 }
 0x2a5   :  { %v942_v13 = vadd.f32 %v941_v12, %v878_v11 }
 0x2a6   :  { %v1159_v14 = vpop.f32.mrf.mxu1 }
 0x2a7   :  { %v948_v15 = vsel %vm947_vm4, %v942_v13, -inf }
 0x2a8   :  { %949 = vmax.xlane.f32.xlu0 %v948_v15  ;;  %v944_v16 = vpop.f32.mrf.mxu1 }
 0x2aa   :  { %v1160_v17 = vpop.f32.mrf.mxu1 }
 0x331   :  { %v950_v18 = vpop.xlane.xlu0 %949 }
 0x332   :  { %v951_v19 = vsub.f32 %v942_v13, %v950_v18 }
 0x334   :  { %v952_v20 = vmul.f32 1.442695, %v951_v19 }
 0x336   :  { %1246 = vpow2.f32 %v952_v20 }
 0x343   :  { %v1247_v21 = vpop.eup %1246 }
 0x344   :  { %v954_v22 = vsel %vm947_vm4, %v1247_v21, 0.0 }
 0x345   :  { %955 = vadd.xlane.f32.xlu0 %v954_v22 }
 0x3ce   :  { %v956_v23 = vpop.xlane.xlu0 %955 }
 0x3cf   :  { %1248 = vlog2.f32 %v956_v23 }
 0x3dc   :  { %v1249_v24 = vpop.eup %1248 }
 0x3dd   :  { %v958_v25 = vmul.f32 0.6931472, %v1249_v24 }
 0x3df   :  { %v959_v26 = vsub.f32 %v951_v19, %v958_v25 }
 0x3e1   :  { %960 = vst.msk [vmem:[#allocation5] sm:$0xff] %vm947_vm4, %v959_v26 }
 0x3e2   :  { %965 = vsyncadd [#allocation4], 96  ;;  %s1301_s4 = smov [#allocation5]  }
 0x3e3   :  { %s966_s5 = sshll.u32 %s1301_s4, 4  ;;  %s967_s5 = int_to_ptr.vmem [resolvable:$true] %s966_s5 }
 0x3e4   :  { %s1270_s6 = scalar_lea.vmem %s967_s5, 32  ;;  %s1274_s17 = scalar_lea.vmem %s967_s5, 128 }
 0x3e5   :  { %p1271_p5 = scmp.ne.s32.totalorder %s967_s5, %s1270_s6  ;;  %p1275_p6 = scmp.lt.s32.totalorder %s967_s5, %s967_s5 }
 0x3e6   :  { %p1276_p7 = scmp.lt.s32.totalorder %s1274_s17, %s1270_s6 }
 0x3e8   :  { %p1277_p8 = por %p1276_p7, %p1275_p6 }
 0x3ea   :  { %p1278_p9 = pnand %p1277_p8, %p1271_p5 }
 0x3ec   :  { %1281 = shalt.err (!%p1278_p9)
}
 0x3ed   :  { %s1302_s18 = smov 32   ;;  %s1303_s19 = smov 2  }
 0x3ee   :  { %972 = dma.vmem_to_hbm [thread:$0]  %s967_s5, 32, %s1462_s7, [#allocation4], %s1302_s18, %s1302_s18, %s1303_s19  }
 0x3ef   :  { %1292 = dma.done.wait [#allocation4], 128  }
 0x3f0   :  { %1293 = vsyncadd [#allocation4], 4294967168 }
 0x3f1   :  { %976 = vsyncpa [#allocation3], 1 }
 0x3f2   :  { %977 = vsyncpa [#allocation4], 1 }

</bundles_post_ra>
